<compile_context>
chip_gen: v7x
topology: tpu7x:2x2x1
jax: 0.10.0
libtpu: 0.0.40
codegen_flags: <defaults>
</compile_context>

<pallas_src>
import functools

import jax
import jax.numpy as jnp
from jax.experimental import pallas as pl
from jax.experimental.pallas import tpu as pltpu

_DEFAULT_VMEM_BUDGET = 14 * 1024 * 1024   # per-tile pipeline budget (v5e-safe)
_VMEM_LIMIT_BYTES = 32 * 1024 * 1024      # scoped-VMEM limit, safe on v5e/v6e/v7x


def _linear_kernel(x_ref, w_ref, o_ref, *, compute_dtype):
    # x tile: (tb, K) f32; weight: (K, N).  Cast x on the VPU right before the
    # MXU dot (free, hidden under the DMA); accumulate in f32.
    x = x_ref[...]
    if compute_dtype is not None and x.dtype != compute_dtype:
        x = x.astype(compute_dtype)
    o_ref[...] = jnp.dot(
        x, w_ref[...], preferred_element_type=jnp.float32
    ).astype(o_ref.dtype)


def _pick_batch_tile(B, K, N, x_itemsize, block_b, vmem_budget):
    # VMEM model: double-buffered f32 x tile + double-buffered f32 out tile.
    per_row = 2 * (K * x_itemsize + N * 4)
    cap = max(8, ((vmem_budget // per_row) // 8) * 8)
    if B <= 16:
        tb = B                                      # tiny batch: one full-batch tile
    else:
        n_tiles = max(2, pl.cdiv(B, block_b))       # >= 2 tiles feeds both v7x TCs
        tb = ((pl.cdiv(B, n_tiles) + 7) // 8) * 8   # sublane-aligned
    return max(1, min(tb, cap))


def logistic_regression_forward(
    x,
    weight,
    *,
    block_b=1024,
    compute_dtype=jnp.bfloat16,
    vmem_budget_bytes=_DEFAULT_VMEM_BUDGET,
):
    """y = x @ weight.T  (nn.Linear with bias=False).

    x:      (B, n_inputs) float32
    weight: (n_outputs, n_inputs)  -- PyTorch nn.Linear layout
    returns (B, n_outputs) float32

    compute_dtype=jnp.bfloat16 (default): bf16 MXU inputs, f32 accumulation.
    compute_dtype=jnp.float32 / None:     keep f32 inputs (PyTorch-like numerics).
    """
    B, K = x.shape
    N, K2 = weight.shape
    assert K == K2, "weight in_features must match x last dim"

    # One-time (tiny) wrapper-side weight prep; x is NOT touched in the wrapper.
    w_dtype = weight.dtype if compute_dtype is None else compute_dtype
    w_t = weight.T.astype(w_dtype)                  # (K, N)

    x_itemsize = jnp.dtype(x.dtype).itemsize
    tb = _pick_batch_tile(B, K, N, x_itemsize, block_b, vmem_budget_bytes)
    grid_b = pl.cdiv(B, tb)

    kernel = functools.partial(_linear_kernel, compute_dtype=compute_dtype)
    cost = pl.CostEstimate(
        flops=2 * B * K * N,
        transcendentals=0,
        bytes_accessed=(
            B * K * x_itemsize
            + K * N * jnp.dtype(w_dtype).itemsize
            + B * N * 4
        ),
    )

    def run(weight_spec):
        return pl.pallas_call(
            kernel,
            out_shape=jax.ShapeDtypeStruct((B, N), jnp.float32),
            grid=(grid_b,),
            in_specs=[
                pl.BlockSpec((tb, K), lambda b: (b, 0)),   # x: tiled over batch
                weight_spec,                               # weight: VMEM-resident
            ],
            out_specs=pl.BlockSpec((tb, N), lambda b: (b, 0)),
            compiler_params=pltpu.CompilerParams(
                dimension_semantics=("parallel",),
                vmem_limit_bytes=_VMEM_LIMIT_BYTES,
            ),
            cost_estimate=cost,
        )(x, w_t)

    try:
        # Constant block index across the grid -> single-buffer the weight.
        return run(
            pl.BlockSpec((K, N), lambda b: (0, 0), pipeline_mode=pl.Buffered(1))
        )
    except Exception:
        # Fallback for runtimes without per-spec pipeline_mode support; the
        # weight block is still fetched only once (constant block index).
        return run(pl.BlockSpec((K, N), lambda b: (0, 0)))


if __name__ == "__main__":
    # MNIST-like shapes: batch=8, n_inputs=784, n_outputs=10
    B, N_IN, N_OUT = 8, 784, 10

    key = jax.random.PRNGKey(0)
    kx, kw, kx2 = jax.random.split(key, 3)

    x = jax.random.normal(kx, (B, N_IN), dtype=jnp.float32)
    # Deterministic init mimicking nn.Linear default: U(-1/sqrt(n_in), 1/sqrt(n_in))
    bound = 1.0 / (N_IN ** 0.5)
    weight = jax.random.uniform(
        kw, (N_OUT, N_IN), dtype=jnp.float32, minval=-bound, maxval=bound
    )

    y_ref = x @ weight.T

    # f32 compute path (MXU f32 matmuls may internally use multi-pass bf16
    # depending on generation, hence the modest tolerance).
    y_f32 = jax.block_until_ready(
        logistic_regression_forward(x, weight, compute_dtype=jnp.float32)
    )
    assert y_f32.shape == (B, N_OUT)
    assert jnp.allclose(y_f32, y_ref, atol=5e-3, rtol=5e-3), "f32 mismatch vs reference"

    # Default bf16-input / f32-accumulate path.
    y_bf16 = jax.block_until_ready(logistic_regression_forward(x, weight))
    assert y_bf16.shape == (B, N_OUT)
    assert jnp.allclose(y_bf16, y_ref, atol=2e-2, rtol=2e-2), "bf16 mismatch vs reference"

    # Multi-tile batch path (grid >= 2 -> exercises the batch-parallel axis).
    B2 = 160
    x2 = jax.random.normal(kx2, (B2, N_IN), dtype=jnp.float32)
    y2 = jax.block_until_ready(
        logistic_regression_forward(x2, weight, compute_dtype=jnp.float32)
    )
    assert y2.shape == (B2, N_OUT)
    assert jnp.allclose(y2, x2 @ weight.T, atol=5e-3, rtol=5e-3), "multi-tile mismatch"

    print("KERNEL_OK")
</pallas_src>

<mosaic_0001>
module attributes {stable_mosaic.version = 11 : i64} {
  func.func @_linear_kernel(%arg0: i32, %arg1: memref<8x784xf32, #tpu.memory_space<vmem>>, %arg2: memref<784x10xf32, #tpu.memory_space<vmem>>, %arg3: memref<8x10xf32, #tpu.memory_space<vmem>>) attributes {dimension_semantics = [#tpu.dimension_semantics<parallel>], iteration_bounds = array<i64: 1>, scalar_prefetch = 0 : i64, scratch_operands = 0 : i64, tpu.core_type = #tpu.core_type<tc>, window_params = [{transform_indices = @transform_0, window_bounds = array<i64: 8, 784>}, {pipeline_mode = #tpu.pipeline_mode<synchronous>, transform_indices = @transform_1, window_bounds = array<i64: 784, 10>}, {transform_indices = @transform_2, window_bounds = array<i64: 8, 10>}]} {
    %c0 = arith.constant 0 : index
    %c0_0 = arith.constant 0 : index
    %0 = vector.load %arg1[%c0, %c0_0] : memref<8x784xf32, #tpu.memory_space<vmem>>, vector<8x784xf32>
    %c0_1 = arith.constant 0 : index
    %c0_2 = arith.constant 0 : index
    %1 = vector.load %arg2[%c0_1, %c0_2] : memref<784x10xf32, #tpu.memory_space<vmem>>, vector<784x10xf32>
    %cst = arith.constant dense<0.000000e+00> : vector<8x10xf32>
    %2 = tpu.matmul %0, %1, %cst {dimension_numbers = #tpu.dot_dimension_numbers<[1], [0], [0], [1], [0, 0, 1, 1], [], []>} : vector<8x784xf32>, vector<784x10xf32>, vector<8x10xf32> -> vector<8x10xf32>
    %c0_3 = arith.constant 0 : index
    %c0_4 = arith.constant 0 : index
    %3 = vector.load %arg3[%c0_3, %c0_4] : memref<8x10xf32, #tpu.memory_space<vmem>>, vector<8x10xf32>
    tpu.vector_store %arg3[%c0_3, %c0_4], %2 {strides = array<i32>} : memref<8x10xf32, #tpu.memory_space<vmem>>, vector<8x10xf32>,
    return
  }
  func.func @transform_0(%arg0: i32) -> (i32, i32) {
    %c0_i32 = arith.constant 0 : i32
    %c0_i32_0 = arith.constant 0 : i32
    return %arg0, %c0_i32 : i32, i32
  }
  func.func @transform_1(%arg0: i32) -> (i32, i32) {
    %c0_i32 = arith.constant 0 : i32
    %c0_i32_0 = arith.constant 0 : i32
    %c0_i32_1 = arith.constant 0 : i32
    return %c0_i32, %c0_i32_0 : i32, i32
  }
  func.func @transform_2(%arg0: i32) -> (i32, i32) {
    %c0_i32 = arith.constant 0 : i32
    %c0_i32_0 = arith.constant 0 : i32
    return %arg0, %c0_i32 : i32, i32
  }
}

module attributes {stable_mosaic.version = 11 : i64} {
  func.func @_linear_kernel(%arg0: i32, %arg1: memref<8x784xf32, #tpu.memory_space<vmem>>, %arg2: memref<784x10xf32, #tpu.memory_space<vmem>>, %arg3: memref<8x10xf32, #tpu.memory_space<vmem>>) attributes {dimension_semantics = [#tpu.dimension_semantics<parallel>], iteration_bounds = array<i64: 1>, scalar_prefetch = 0 : i64, scratch_operands = 0 : i64, tpu.core_type = #tpu.core_type<tc>, window_params = [{transform_indices = @transform_0, window_bounds = array<i64: 8, 784>}, {pipeline_mode = #tpu.pipeline_mode<synchronous>, transform_indices = @transform_1, window_bounds = array<i64: 784, 10>}, {transform_indices = @transform_2, window_bounds = array<i64: 8, 10>}]} {
    %c0 = arith.constant 0 : index
    %c0_0 = arith.constant 0 : index
    %0 = vector.load %arg1[%c0, %c0_0] : memref<8x784xf32, #tpu.memory_space<vmem>>, vector<8x784xf32>
    %c0_1 = arith.constant 0 : index
    %c0_2 = arith.constant 0 : index
    %1 = vector.load %arg2[%c0_1, %c0_2] : memref<784x10xf32, #tpu.memory_space<vmem>>, vector<784x10xf32>
    %cst = arith.constant dense<0.000000e+00> : vector<8x10xf32>
    %2 = tpu.matmul %0, %1, %cst {dimension_numbers = #tpu.dot_dimension_numbers<[1], [0], [0], [1], [0, 0, 1, 1], [], []>} : vector<8x784xf32>, vector<784x10xf32>, vector<8x10xf32> -> vector<8x10xf32>
    %c0_3 = arith.constant 0 : index
    %c0_4 = arith.constant 0 : index
    %3 = vector.load %arg3[%c0_3, %c0_4] : memref<8x10xf32, #tpu.memory_space<vmem>>, vector<8x10xf32>
    tpu.vector_store %arg3[%c0_3, %c0_4], %2 {strides = array<i32>} : memref<8x10xf32, #tpu.memory_space<vmem>>, vector<8x10xf32>,
    return
  }
  func.func @transform_0(%arg0: i32) -> (i32, i32) {
    %c0_i32 = arith.constant 0 : i32
    %c0_i32_0 = arith.constant 0 : i32
    return %arg0, %c0_i32 : i32, i32
  }
  func.func @transform_1(%arg0: i32) -> (i32, i32) {
    %c0_i32 = arith.constant 0 : i32
    %c0_i32_0 = arith.constant 0 : i32
    %c0_i32_1 = arith.constant 0 : i32
    return %c0_i32, %c0_i32_0 : i32, i32
  }
  func.func @transform_2(%arg0: i32) -> (i32, i32) {
    %c0_i32 = arith.constant 0 : i32
    %c0_i32_0 = arith.constant 0 : i32
    return %arg0, %c0_i32 : i32, i32
  }
}

</mosaic_0001>

<bundles_post_ra>
// kernel: tpu_custom_call.1
= control target key start
LH: loop header
LB: loop body
LE: loop exit
PB: predicated region body
PF: predicated region fallthrough
CT: control target
= control target key end

     0   :  { %s1006_s0 = inlined_call_operand.vmem [shape: f32[8,784], index: 0, kind: input, shape index: {}]   ;;  %s1007_s1 = inlined_call_operand.vmem [shape: f32[784,10], index: 1, kind: input, shape index: {}]   ;;  %s1008_s2 = inlined_call_operand.hbm [shape: f32[8,10], index: 2, kind: output, shape index: {}]  }
   0x1   :  { %v35_v0 = vld [vmem:[%s1007_s1 + $0x80] sm:$0xff]  ;;  %v36_v1 = vld [vmem:[%s1007_s1 + $0x88] sm:$0xff]  ;;  %v37_v11 = vld [vmem:[%s1007_s1 + $0x90] sm:$0xff] }
   0x2   :  { %v67_v2 = vld [vmem:[%s1007_s1 + $0x180] sm:$0xff]  ;;  %v533_v3 = vpack.c.bf16 %v36_v1, %v35_v0  ;;  %v68_v4 = vld [vmem:[%s1007_s1 + $0x188] sm:$0xff]  ;;  %v38_v13 = vld [vmem:[%s1007_s1 + $0x98] sm:$0xff] }
   0x3   :  { %v19_v5 = vld [vmem:[%s1007_s1] sm:$0xff]  ;;  %v20_v6 = vld [vmem:[%s1007_s1 + $0x8] sm:$0xff]  ;;  %v565_v7 = vpack.c.bf16 %v68_v4, %v67_v2  ;;  %v69_v14 = vld [vmem:[%s1007_s1 + $0x190] sm:$0xff]  ;;  %v537_v16 = vpack.c.bf16 %v38_v13, %v37_v11 }
   0x4   :  { %v535_v8 = vpack.c.bf16 %v20_v6, %v19_v5  ;;  %v51_v9 = vld [vmem:[%s1007_s1 + $0x100] sm:$0xff]  ;;  %v52_v10 = vld [vmem:[%s1007_s1 + $0x108] sm:$0xff]  ;;  %534 = vmatprep.subr.bf16.mxu0 %v533_v3  ;;  %v70_v15 = vld [vmem:[%s1007_s1 + $0x198] sm:$0xff] }
   0x5   :  { %v567_v12 = vpack.c.bf16 %v52_v10, %v51_v9  ;;  %566 = vmatprep.subr.bf16.mxu1 %v565_v7  ;;  %v569_v17 = vpack.c.bf16 %v70_v15, %v69_v14  ;;  %v21_v18 = vld [vmem:[%s1007_s1 + $0x10] sm:$0xff]  ;;  %v22_v19 = vld [vmem:[%s1007_s1 + $0x18] sm:$0xff]  ;;  %v39_v23 = vld [vmem:[%s1007_s1 + $0xa0] sm:$0xff] }
   0x6   :  { %536 = vmatpush3.bf16.msra.mxu0 %v535_v8  ;;  %v53_v20 = vld [vmem:[%s1007_s1 + $0x110] sm:$0xff]  ;;  %v539_v21 = vpack.c.bf16 %v22_v19, %v21_v18  ;;  %v54_v22 = vld [vmem:[%s1007_s1 + $0x118] sm:$0xff]  ;;  %v40_v24 = vld [vmem:[%s1007_s1 + $0xa8] sm:$0xff] }
   0x7   :  { %568 = vmatpush3.bf16.msra.mxu1 %v567_v12  ;;  %538 = vmatprep.subr.bf16.mxu0 %v537_v16  ;;  %v571_v25 = vpack.c.bf16 %v54_v22, %v53_v20  ;;  %v541_v26 = vpack.c.bf16 %v40_v24, %v39_v23  ;;  %v71_v27 = vld [vmem:[%s1007_s1 + $0x1a0] sm:$0xff]  ;;  %v72_v28 = vld [vmem:[%s1007_s1 + $0x1a8] sm:$0xff]  ;;  %v41_v35 = vld [vmem:[%s1007_s1 + $0xb0] sm:$0xff] }
   0x8   :  { %570 = vmatprep.subr.bf16.mxu1 %v569_v17  ;;  %v23_v29 = vld [vmem:[%s1007_s1 + $0x20] sm:$0xff]  ;;  %v573_v30 = vpack.c.bf16 %v72_v28, %v71_v27  ;;  %v24_v31 = vld [vmem:[%s1007_s1 + $0x28] sm:$0xff]  ;;  %v42_v36 = vld [vmem:[%s1007_s1 + $0xb8] sm:$0xff] }
   0x9   :  { %v55_v32 = vld [vmem:[%s1007_s1 + $0x120] sm:$0xff]  ;;  %v56_v33 = vld [vmem:[%s1007_s1 + $0x128] sm:$0xff]  ;;  %v543_v34 = vpack.c.bf16 %v24_v31, %v23_v29  ;;  %v73_v37 = vld [vmem:[%s1007_s1 + $0x1b0] sm:$0xff]  ;;  %v545_v39 = vpack.c.bf16 %v42_v36, %v41_v35 }
   0xa   :  { %540 = vmatpush3.bf16.msra.mxu0 %v539_v21  ;;  %v575_v38 = vpack.c.bf16 %v56_v33, %v55_v32  ;;  %v74_v40 = vld [vmem:[%s1007_s1 + $0x1b8] sm:$0xff]  ;;  %v25_v41 = vld [vmem:[%s1007_s1 + $0x30] sm:$0xff]  ;;  %v43_v46 = vld [vmem:[%s1007_s1 + $0xc0] sm:$0xff] }
   0xb   :  { %572 = vmatpush3.bf16.msra.mxu1 %v571_v25  ;;  %542 = vmatprep.subr.bf16.mxu0 %v541_v26  ;;  %v26_v42 = vld [vmem:[%s1007_s1 + $0x38] sm:$0xff]  ;;  %v577_v43 = vpack.c.bf16 %v74_v40, %v73_v37  ;;  %v57_v44 = vld [vmem:[%s1007_s1 + $0x130] sm:$0xff]  ;;  %v44_v47 = vld [vmem:[%s1007_s1 + $0xc8] sm:$0xff] }
   0xc   :  { %574 = vmatprep.subr.bf16.mxu1 %v573_v30  ;;  %v58_v45 = vld [vmem:[%s1007_s1 + $0x138] sm:$0xff]  ;;  %v75_v48 = vld [vmem:[%s1007_s1 + $0x1c0] sm:$0xff]  ;;  %v76_v49 = vld [vmem:[%s1007_s1 + $0x1c8] sm:$0xff]  ;;  %v547_v50 = vpack.c.bf16 %v26_v42, %v25_v41  ;;  %v549_v52 = vpack.c.bf16 %v44_v47, %v43_v46 }
   0xd   :  { %v579_v51 = vpack.c.bf16 %v58_v45, %v57_v44  ;;  %v27_v53 = vld [vmem:[%s1007_s1 + $0x40] sm:$0xff]  ;;  %v28_v54 = vld [vmem:[%s1007_s1 + $0x48] sm:$0xff]  ;;  %v581_v56 = vpack.c.bf16 %v76_v49, %v75_v48  ;;  %v45_v58 = vld [vmem:[%s1007_s1 + $0xd0] sm:$0xff] }
   0xe   :  { %544 = vmatpush3.bf16.msra.mxu0 %v543_v34  ;;  %v59_v55 = vld [vmem:[%s1007_s1 + $0x140] sm:$0xff]  ;;  %v60_v57 = vld [vmem:[%s1007_s1 + $0x148] sm:$0xff]  ;;  %v46_v59 = vld [vmem:[%s1007_s1 + $0xd8] sm:$0xff]  ;;  %v551_v62 = vpack.c.bf16 %v28_v54, %v27_v53 }
   0xf   :  { %576 = vmatpush3.bf16.msra.mxu1 %v575_v38  ;;  %546 = vmatprep.subr.bf16.mxu0 %v545_v39  ;;  %v77_v60 = vld [vmem:[%s1007_s1 + $0x1d0] sm:$0xff]  ;;  %v78_v61 = vld [vmem:[%s1007_s1 + $0x1d8] sm:$0xff]  ;;  %v583_v63 = vpack.c.bf16 %v60_v57, %v59_v55  ;;  %v553_v0 = vpack.c.bf16 %v46_v59, %v45_v58  ;;  %v47_v6 = vld [vmem:[%s1007_s1 + $0xe0] sm:$0xff] }
  0x10   :  { %578 = vmatprep.subr.bf16.mxu1 %v577_v43  ;;  %v29_v1 = vld [vmem:[%s1007_s1 + $0x50] sm:$0xff]  ;;  %v30_v2 = vld [vmem:[%s1007_s1 + $0x58] sm:$0xff]  ;;  %v585_v4 = vpack.c.bf16 %v78_v61, %v77_v60  ;;  %v48_v7 = vld [vmem:[%s1007_s1 + $0xe8] sm:$0xff] }
  0x11   :  { %v61_v3 = vld [vmem:[%s1007_s1 + $0x150] sm:$0xff]  ;;  %v62_v5 = vld [vmem:[%s1007_s1 + $0x158] sm:$0xff]  ;;  %v79_v8 = vld [vmem:[%s1007_s1 + $0x1e0] sm:$0xff]  ;;  %v555_v10 = vpack.c.bf16 %v30_v2, %v29_v1  ;;  %v557_v14 = vpack.c.bf16 %v48_v7, %v47_v6 }
  0x12   :  { %548 = vmatpush3.bf16.msra.mxu0 %v547_v50  ;;  %v80_v9 = vld [vmem:[%s1007_s1 + $0x1e8] sm:$0xff]  ;;  %v31_v11 = vld [vmem:[%s1007_s1 + $0x60] sm:$0xff]  ;;  %v587_v13 = vpack.c.bf16 %v62_v5, %v61_v3  ;;  %v15_v17 = vld [vmem:[%s1006_s0 + $0x18] sm:$0xff]  ;;  %v660_v50 = vmov 0.0|0.0  }
  0x13   :  { %580 = vmatpush3.bf16.msra.mxu1 %v579_v51  ;;  %550 = vmatprep.subr.bf16.mxu0 %v549_v52  ;;  %v32_v12 = vld [vmem:[%s1007_s1 + $0x68] sm:$0xff]  ;;  %v63_v15 = vld [vmem:[%s1007_s1 + $0x160] sm:$0xff]  ;;  %v589_v18 = vpack.c.bf16 %v80_v9, %v79_v8  ;;  %v49_v20 = vld [vmem:[%s1007_s1 + $0xf0] sm:$0xff] }
  0x14   :  { %582 = vmatprep.subr.bf16.mxu1 %v581_v56  ;;  %v13_v16 = vld [vmem:[%s1006_s0 + $0x8] sm:$0xff]  ;;  %v50_v21 = vld [vmem:[%s1007_s1 + $0xf8] sm:$0xff]  ;;  %v81_v22 = vld [vmem:[%s1007_s1 + $0x1f0] sm:$0xff]  ;;  %255 = vmatprep.mubr.f32.mxu1 %v15_v17  ;;  %v559_v24 = vpack.c.bf16 %v32_v12, %v31_v11 }
  0x15   :  { %v64_v19 = vld [vmem:[%s1007_s1 + $0x168] sm:$0xff]  ;;  %185 = vmatprep.mubr.f32.mxu0 %v13_v16  ;;  %v82_v23 = vld [vmem:[%s1007_s1 + $0x1f8] sm:$0xff]  ;;  %v561_v26 = vpack.c.bf16 %v50_v21, %v49_v20  ;;  %v33_v27 = vld [vmem:[%s1007_s1 + $0x70] sm:$0xff] }
  0x16   :  { %552 = vmatpush3.bf16.msra.mxu0 %v551_v62  ;;  %v591_v25 = vpack.c.bf16 %v64_v19, %v63_v15  ;;  %v34_v28 = vld [vmem:[%s1007_s1 + $0x78] sm:$0xff]  ;;  %v65_v29 = vld [vmem:[%s1007_s1 + $0x170] sm:$0xff]  ;;  %v593_v30 = vpack.c.bf16 %v82_v23, %v81_v22  ;;  %v99_v32 = vld [vmem:[%s1007_s1 + $0x280] sm:$0xff] }
  0x17   :  { %584 = vmatpush3.bf16.msra.mxu1 %v583_v63  ;;  %554 = vmatprep.subr.bf16.mxu0 %v553_v0  ;;  %v66_v31 = vld [vmem:[%s1007_s1 + $0x178] sm:$0xff]  ;;  %v100_v33 = vld [vmem:[%s1007_s1 + $0x288] sm:$0xff]  ;;  %v563_v34 = vpack.c.bf16 %v34_v28, %v33_v27  ;;  %v83_v37 = vld [vmem:[%s1007_s1 + $0x200] sm:$0xff] }
  0x18   :  { %586 = vmatprep.subr.bf16.mxu1 %v585_v4  ;;  %v595_v35 = vpack.c.bf16 %v66_v31, %v65_v29  ;;  %v597_v36 = vpack.c.bf16 %v100_v33, %v99_v32  ;;  %v84_v38 = vld [vmem:[%s1007_s1 + $0x208] sm:$0xff]  ;;  %v101_v39 = vld [vmem:[%s1007_s1 + $0x290] sm:$0xff]  ;;  %v102_v40 = vld [vmem:[%s1007_s1 + $0x298] sm:$0xff] }
  0x19   :  { %v12_v41 = vld [vmem:[%s1006_s0] sm:$0xff]  ;;  %v14_v42 = vld [vmem:[%s1006_s0 + $0x10] sm:$0xff]  ;;  %v599_v43 = vpack.c.bf16 %v84_v38, %v83_v37  ;;  %v601_v45 = vpack.c.bf16 %v102_v40, %v101_v39  ;;  %v86_v46 = vld [vmem:[%s1007_s1 + $0x218] sm:$0xff] }
  0x1a   :  { %556 = vmatpush3.bf16.msra.mxu0 %v555_v10  ;;  %v85_v44 = vld [vmem:[%s1007_s1 + $0x210] sm:$0xff]  ;;  %v103_v47 = vld [vmem:[%s1007_s1 + $0x2a0] sm:$0xff]  ;;  %v104_v48 = vld [vmem:[%s1007_s1 + $0x2a8] sm:$0xff] }
  0x1b   :  { %588 = vmatpush3.bf16.msra.mxu1 %v587_v13  ;;  %558 = vmatprep.subr.bf16.mxu0 %v557_v14  ;;  %v17_v49 = vld [vmem:[%s1006_s0 + $0x28] sm:$0xff]  ;;  %v115_v51 = vld [vmem:[%s1007_s1 + $0x300] sm:$0xff] }
  0x1c   :  { %590 = vmatprep.subr.bf16.mxu1 %v589_v18  ;;  %v116_v52 = vld [vmem:[%s1007_s1 + $0x308] sm:$0xff] }
  0x1d   :  { %v630_v53 = vpack.c.bf16 %v116_v52, %v115_v51 }
  0x1e   :  { %560 = vmatpush3.bf16.msra.mxu0 %v559_v24 }
  0x1f   :  { %592 = vmatpush3.bf16.msra.mxu1 %v591_v25  ;;  %562 = vmatprep.subr.bf16.mxu0 %v561_v26 }
  0x20   :  { %594 = vmatprep.subr.bf16.mxu1 %v593_v30 }
  0x22   :  { %564 = vmatpush3.bf16.msra.mxu0 %v563_v34 }
  0x23   :  { %596 = vmatpush3.bf16.msra.mxu1 %v595_v35  ;;  %598 = vmatprep.subr.bf16.mxu0 %v597_v36 }
  0x24   :  { %629 = vmatprep.subr.bf16.mxu1 %v660_v50 }
  0x25   :  { %186 = vmatmul.mubr.f32.vlgmr.msra.gmra.mrb[0].mxu0 %v12_v41 }
  0x26   :  { %7 = vsyncpa [#allocation3], 0  ;;  %256 = vmatmul.mubr.f32.vlgmr.msra.gmra.mrb[0].mxu1 %v14_v42  ;;  %600 = vmatpush3.bf16.msra.mxu0 %v599_v43  ;;  %v603_v54 = vpack.c.bf16 %v86_v46, %v85_v44  ;;  %v605_v55 = vpack.c.bf16 %v104_v48, %v103_v47  ;;  %v87_v56 = vld [vmem:[%s1007_s1 + $0x220] sm:$0xff]  ;;  %v88_v57 = vld [vmem:[%s1007_s1 + $0x228] sm:$0xff]  ;;  %vm661_vm0 = vmmov 0   ;;  %v662_v60 = vmov 0.0  }
  0x27   :  { %602 = vmatprep.subr.bf16.mxu0 %v601_v45  ;;  %325 = vmatprep.mubr.f32.mxu0 %v17_v49  ;;  %v105_v58 = vld [vmem:[%s1007_s1 + $0x2b0] sm:$0xff]  ;;  %v106_v59 = vld [vmem:[%s1007_s1 + $0x2b8] sm:$0xff]  ;;  %vm117_vm1 = vcmask 130048   ;;  %v607_v62 = vpack.c.bf16 %v88_v57, %v87_v56  ;;  %v107_v2 = vld [vmem:[%s1007_s1 + $0x2c0] sm:$0xff]  ;;  %vm401_vm2 = vcmask 80896  }
  0x28   :  { %631 = vmatpush3.bf16.msra.mxu1 %v630_v53  ;;  %530 = vmatprep.mubr.msk.f32.mxu1 %vm661_vm0, %v662_v60  ;;  %v18_v61 = vld [vmem:[%s1006_s0 + $0x30] sm:$0xff]  ;;  %v609_v63 = vpack.c.bf16 %v106_v59, %v105_v58  ;;  %v90_v1 = vld [vmem:[%s1007_s1 + $0x238] sm:$0xff]  ;;  %v108_v3 = vld [vmem:[%s1007_s1 + $0x2c8] sm:$0xff] }
  0x29   :  { %v89_v0 = vld [vmem:[%s1007_s1 + $0x230] sm:$0xff]  ;;  %v613_v5 = vpack.c.bf16 %v108_v3, %v107_v2  ;;  %v91_v6 = vld [vmem:[%s1007_s1 + $0x240] sm:$0xff]  ;;  %v92_v7 = vld [vmem:[%s1007_s1 + $0x248] sm:$0xff] }
  0x2a   :  { %604 = vmatpush3.bf16.msra.mxu0 %v603_v54  ;;  %v611_v4 = vpack.c.bf16 %v90_v1, %v89_v0  ;;  %v109_v8 = vld [vmem:[%s1007_s1 + $0x2d0] sm:$0xff]  ;;  %v110_v9 = vld [vmem:[%s1007_s1 + $0x2d8] sm:$0xff]  ;;  %v615_v10 = vpack.c.bf16 %v92_v7, %v91_v6  ;;  %v111_v14 = vld [vmem:[%s1007_s1 + $0x2e0] sm:$0xff] }
  0x2b   :  { %606 = vmatprep.subr.bf16.mxu0 %v605_v55  ;;  %531 = vmatmul.mubr.msk.f32.vlgmr.msra.gmra.mrb[2].mxu1 %vm117_vm1, %v18_v61  ;;  %v617_v11 = vpack.c.bf16 %v110_v9, %v109_v8  ;;  %v93_v12 = vld [vmem:[%s1007_s1 + $0x250] sm:$0xff]  ;;  %v94_v13 = vld [vmem:[%s1007_s1 + $0x258] sm:$0xff]  ;;  %v112_v15 = vld [vmem:[%s1007_s1 + $0x2e8] sm:$0xff] }
  0x2c   :  { %v619_v16 = vpack.c.bf16 %v94_v13, %v93_v12  ;;  %v621_v17 = vpack.c.bf16 %v112_v15, %v111_v14  ;;  %v95_v18 = vld [vmem:[%s1007_s1 + $0x260] sm:$0xff]  ;;  %v96_v19 = vld [vmem:[%s1007_s1 + $0x268] sm:$0xff]  ;;  %v113_v20 = vld [vmem:[%s1007_s1 + $0x2f0] sm:$0xff] }
  0x2d   :  { %v114_v21 = vld [vmem:[%s1007_s1 + $0x2f8] sm:$0xff]  ;;  %v623_v22 = vpack.c.bf16 %v96_v19, %v95_v18  ;;  %v97_v24 = vld [vmem:[%s1007_s1 + $0x270] sm:$0xff]  ;;  %v16_v27 = vld [vmem:[%s1006_s0 + $0x20] sm:$0xff] }
  0x2e   :  { %608 = vmatpush3.bf16.msra.mxu0 %v607_v62  ;;  %v625_v23 = vpack.c.bf16 %v114_v21, %v113_v20  ;;  %v98_v25 = vld [vmem:[%s1007_s1 + $0x278] sm:$0xff]  ;;  %s663_s1 = smov [#allocation2]  }
  0x2f   :  { %610 = vmatprep.subr.bf16.mxu0 %v609_v63  ;;  %v627_v26 = vpack.c.bf16 %v98_v25, %v97_v24  ;;  %s409_s23 = sshll.u32 %s663_s1, 4  ;;  %s410_s23 = int_to_ptr.vmem [resolvable:$true] %s409_s23 }
  0x30   :  { %s636_s0 = scalar_lea.vmem %s410_s23, 128  ;;  %p641_p1 = scmp.lt.s32.totalorder %s410_s23, %s410_s23 }
  0x31   :  { %p637_p0 = scmp.ne.s32.totalorder %s410_s23, %s636_s0  ;;  %p642_p2 = scmp.lt.s32.totalorder %s636_s0, %s636_s0 }
  0x32   :  { %612 = vmatpush3.bf16.msra.mxu0 %v611_v4 }
  0x33   :  { %614 = vmatprep.subr.bf16.mxu0 %v613_v5  ;;  %p643_p3 = por %p642_p2, %p641_p1 }
  0x35   :  { %p644_p4 = pnand %p643_p3, %p637_p0 }
  0x36   :  { %616 = vmatpush3.bf16.msra.mxu0 %v615_v10 }
  0x37   :  { %618 = vmatprep.subr.bf16.mxu0 %v617_v11 }
  0x3a   :  { %620 = vmatpush3.bf16.msra.mxu0 %v619_v16 }
  0x3b   :  { %622 = vmatprep.subr.bf16.mxu0 %v621_v17 }
  0x3e   :  { %624 = vmatpush3.bf16.msra.mxu0 %v623_v22 }
  0x3f   :  { %626 = vmatprep.subr.bf16.mxu0 %v625_v23 }
  0x42   :  { %628 = vmatpush3.bf16.msra.mxu0 %v627_v26 }
  0x45   :  { %326 = vmatmul.mubr.f32.vlgmr.msra.gmra.mrb[2].mxu0 %v16_v27 }
  0xf8   :  { %v450_v28 = vpop.f32.mrb[0].mxu0 }
  0xf9   :  { %v485_v29 = vpop.f32.mrb[0].mxu1  ;;  %v451_v30 = vpop.f32.mrb[1].mxu0 }
  0xfa   :  { %v452_v31 = vadd.f32 %v451_v30, %v450_v28  ;;  %v486_v32 = vpop.f32.mrb[1].mxu1 }
  0xfb   :  { %v487_v33 = vadd.f32 %v486_v32, %v485_v29 }
  0xfd   :  { %v258_v34 = vadd.f32 %v487_v33, %v452_v31 }
  0xfe   :  { %v397_v35 = vpop.f32.mrb[2].mxu1 }
  0xff   :  { %v532_v36 = vpop.f32.mrb[3].mxu1 }
 0x118   :  { %v520_v37 = vpop.f32.mrb[2].mxu0 }
 0x119   :  { %v521_v38 = vpop.f32.mrb[3].mxu0 }
 0x11a   :  { %v522_v39 = vadd.f32 %v521_v38, %v520_v37 }
 0x11c   :  { %v328_v40 = vadd.f32 %v522_v39, %v258_v34 }
 0x11e   :  { %v398_v41 = vadd.f32 %v397_v35, %v328_v40 }
 0x120   :  { %402 = vst.msk [vmem:[#allocation2] sm:$0xff] %vm401_vm2, %v398_v41 }
 0x121   :  { %647 = shalt.err (!%p644_p4)
}
 0x122   :  { %s648_s26 = scalar_lea.hbm %s1008_s2, 128 }
 0x123   :  { %p649_p5 = scmp.ne.s32.totalorder %s1008_s2, %s648_s26  ;;  %p652_p6 = scmp.lt.u32.totalorder %s648_s26, %s1008_s2 }
 0x125   :  { %p654_p7 = pnand %p652_p6, %p649_p5 }
 0x127   :  { %657 = shalt.err (!%p654_p7)
}
 0x128   :  { %412 = dma.vmem_to_hbm [thread:$0]  %s410_s23, 128, %s1008_s2, [#allocation3]  }
 0x129   :  { %658 = dma.done.wait [#allocation3], 128  }
 0x12a   :  { %659 = vsyncadd [#allocation3], 4294967168 }
 0x12b   :  { %416 = vsyncpa [#allocation3], 1 }

// kernel: tpu_custom_call.1
= control target key start
LH: loop header
LB: loop body
LE: loop exit
PB: predicated region body
PF: predicated region fallthrough
CT: control target
= control target key end

     0   :  { %s1006_s0 = inlined_call_operand.vmem [shape: f32[8,784], index: 0, kind: input, shape index: {}]   ;;  %s1007_s1 = inlined_call_operand.vmem [shape: f32[784,10], index: 1, kind: input, shape index: {}]   ;;  %s1008_s2 = inlined_call_operand.hbm [shape: f32[8,10], index: 2, kind: output, shape index: {}]  }
   0x1   :  { %v35_v0 = vld [vmem:[%s1007_s1 + $0x80] sm:$0xff]  ;;  %v36_v1 = vld [vmem:[%s1007_s1 + $0x88] sm:$0xff]  ;;  %v37_v11 = vld [vmem:[%s1007_s1 + $0x90] sm:$0xff] }
   0x2   :  { %v67_v2 = vld [vmem:[%s1007_s1 + $0x180] sm:$0xff]  ;;  %v533_v3 = vpack.c.bf16 %v36_v1, %v35_v0  ;;  %v68_v4 = vld [vmem:[%s1007_s1 + $0x188] sm:$0xff]  ;;  %v38_v13 = vld [vmem:[%s1007_s1 + $0x98] sm:$0xff] }
   0x3   :  { %v19_v5 = vld [vmem:[%s1007_s1] sm:$0xff]  ;;  %v20_v6 = vld [vmem:[%s1007_s1 + $0x8] sm:$0xff]  ;;  %v565_v7 = vpack.c.bf16 %v68_v4, %v67_v2  ;;  %v69_v14 = vld [vmem:[%s1007_s1 + $0x190] sm:$0xff]  ;;  %v537_v16 = vpack.c.bf16 %v38_v13, %v37_v11 }
   0x4   :  { %v535_v8 = vpack.c.bf16 %v20_v6, %v19_v5  ;;  %v51_v9 = vld [vmem:[%s1007_s1 + $0x100] sm:$0xff]  ;;  %v52_v10 = vld [vmem:[%s1007_s1 + $0x108] sm:$0xff]  ;;  %534 = vmatprep.subr.bf16.mxu0 %v533_v3  ;;  %v70_v15 = vld [vmem:[%s1007_s1 + $0x198] sm:$0xff] }
   0x5   :  { %v567_v12 = vpack.c.bf16 %v52_v10, %v51_v9  ;;  %566 = vmatprep.subr.bf16.mxu1 %v565_v7  ;;  %v569_v17 = vpack.c.bf16 %v70_v15, %v69_v14  ;;  %v21_v18 = vld [vmem:[%s1007_s1 + $0x10] sm:$0xff]  ;;  %v22_v19 = vld [vmem:[%s1007_s1 + $0x18] sm:$0xff]  ;;  %v39_v23 = vld [vmem:[%s1007_s1 + $0xa0] sm:$0xff] }
   0x6   :  { %536 = vmatpush3.bf16.msra.mxu0 %v535_v8  ;;  %v53_v20 = vld [vmem:[%s1007_s1 + $0x110] sm:$0xff]  ;;  %v539_v21 = vpack.c.bf16 %v22_v19, %v21_v18  ;;  %v54_v22 = vld [vmem:[%s1007_s1 + $0x118] sm:$0xff]  ;;  %v40_v24 = vld [vmem:[%s1007_s1 + $0xa8] sm:$0xff] }
   0x7   :  { %568 = vmatpush3.bf16.msra.mxu1 %v567_v12  ;;  %538 = vmatprep.subr.bf16.mxu0 %v537_v16  ;;  %v571_v25 = vpack.c.bf16 %v54_v22, %v53_v20  ;;  %v541_v26 = vpack.c.bf16 %v40_v24, %v39_v23  ;;  %v71_v27 = vld [vmem:[%s1007_s1 + $0x1a0] sm:$0xff]  ;;  %v72_v28 = vld [vmem:[%s1007_s1 + $0x1a8] sm:$0xff]  ;;  %v41_v35 = vld [vmem:[%s1007_s1 + $0xb0] sm:$0xff] }
   0x8   :  { %570 = vmatprep.subr.bf16.mxu1 %v569_v17  ;;  %v23_v29 = vld [vmem:[%s1007_s1 + $0x20] sm:$0xff]  ;;  %v573_v30 = vpack.c.bf16 %v72_v28, %v71_v27  ;;  %v24_v31 = vld [vmem:[%s1007_s1 + $0x28] sm:$0xff]  ;;  %v42_v36 = vld [vmem:[%s1007_s1 + $0xb8] sm:$0xff] }
   0x9   :  { %v55_v32 = vld [vmem:[%s1007_s1 + $0x120] sm:$0xff]  ;;  %v56_v33 = vld [vmem:[%s1007_s1 + $0x128] sm:$0xff]  ;;  %v543_v34 = vpack.c.bf16 %v24_v31, %v23_v29  ;;  %v73_v37 = vld [vmem:[%s1007_s1 + $0x1b0] sm:$0xff]  ;;  %v545_v39 = vpack.c.bf16 %v42_v36, %v41_v35 }
   0xa   :  { %540 = vmatpush3.bf16.msra.mxu0 %v539_v21  ;;  %v575_v38 = vpack.c.bf16 %v56_v33, %v55_v32  ;;  %v74_v40 = vld [vmem:[%s1007_s1 + $0x1b8] sm:$0xff]  ;;  %v25_v41 = vld [vmem:[%s1007_s1 + $0x30] sm:$0xff]  ;;  %v43_v46 = vld [vmem:[%s1007_s1 + $0xc0] sm:$0xff] }
   0xb   :  { %572 = vmatpush3.bf16.msra.mxu1 %v571_v25  ;;  %542 = vmatprep.subr.bf16.mxu0 %v541_v26  ;;  %v26_v42 = vld [vmem:[%s1007_s1 + $0x38] sm:$0xff]  ;;  %v577_v43 = vpack.c.bf16 %v74_v40, %v73_v37  ;;  %v57_v44 = vld [vmem:[%s1007_s1 + $0x130] sm:$0xff]  ;;  %v44_v47 = vld [vmem:[%s1007_s1 + $0xc8] sm:$0xff] }
   0xc   :  { %574 = vmatprep.subr.bf16.mxu1 %v573_v30  ;;  %v58_v45 = vld [vmem:[%s1007_s1 + $0x138] sm:$0xff]  ;;  %v75_v48 = vld [vmem:[%s1007_s1 + $0x1c0] sm:$0xff]  ;;  %v76_v49 = vld [vmem:[%s1007_s1 + $0x1c8] sm:$0xff]  ;;  %v547_v50 = vpack.c.bf16 %v26_v42, %v25_v41  ;;  %v549_v52 = vpack.c.bf16 %v44_v47, %v43_v46 }
   0xd   :  { %v579_v51 = vpack.c.bf16 %v58_v45, %v57_v44  ;;  %v27_v53 = vld [vmem:[%s1007_s1 + $0x40] sm:$0xff]  ;;  %v28_v54 = vld [vmem:[%s1007_s1 + $0x48] sm:$0xff]  ;;  %v581_v56 = vpack.c.bf16 %v76_v49, %v75_v48  ;;  %v45_v58 = vld [vmem:[%s1007_s1 + $0xd0] sm:$0xff] }
   0xe   :  { %544 = vmatpush3.bf16.msra.mxu0 %v543_v34  ;;  %v59_v55 = vld [vmem:[%s1007_s1 + $0x140] sm:$0xff]  ;;  %v60_v57 = vld [vmem:[%s1007_s1 + $0x148] sm:$0xff]  ;;  %v46_v59 = vld [vmem:[%s1007_s1 + $0xd8] sm:$0xff]  ;;  %v551_v62 = vpack.c.bf16 %v28_v54, %v27_v53 }
   0xf   :  { %576 = vmatpush3.bf16.msra.mxu1 %v575_v38  ;;  %546 = vmatprep.subr.bf16.mxu0 %v545_v39  ;;  %v77_v60 = vld [vmem:[%s1007_s1 + $0x1d0] sm:$0xff]  ;;  %v78_v61 = vld [vmem:[%s1007_s1 + $0x1d8] sm:$0xff]  ;;  %v583_v63 = vpack.c.bf16 %v60_v57, %v59_v55  ;;  %v553_v0 = vpack.c.bf16 %v46_v59, %v45_v58  ;;  %v47_v6 = vld [vmem:[%s1007_s1 + $0xe0] sm:$0xff] }
  0x10   :  { %578 = vmatprep.subr.bf16.mxu1 %v577_v43  ;;  %v29_v1 = vld [vmem:[%s1007_s1 + $0x50] sm:$0xff]  ;;  %v30_v2 = vld [vmem:[%s1007_s1 + $0x58] sm:$0xff]  ;;  %v585_v4 = vpack.c.bf16 %v78_v61, %v77_v60  ;;  %v48_v7 = vld [vmem:[%s1007_s1 + $0xe8] sm:$0xff] }
  0x11   :  { %v61_v3 = vld [vmem:[%s1007_s1 + $0x150] sm:$0xff]  ;;  %v62_v5 = vld [vmem:[%s1007_s1 + $0x158] sm:$0xff]  ;;  %v79_v8 = vld [vmem:[%s1007_s1 + $0x1e0] sm:$0xff]  ;;  %v555_v10 = vpack.c.bf16 %v30_v2, %v29_v1  ;;  %v557_v14 = vpack.c.bf16 %v48_v7, %v47_v6 }
  0x12   :  { %548 = vmatpush3.bf16.msra.mxu0 %v547_v50  ;;  %v80_v9 = vld [vmem:[%s1007_s1 + $0x1e8] sm:$0xff]  ;;  %v31_v11 = vld [vmem:[%s1007_s1 + $0x60] sm:$0xff]  ;;  %v587_v13 = vpack.c.bf16 %v62_v5, %v61_v3  ;;  %v15_v17 = vld [vmem:[%s1006_s0 + $0x18] sm:$0xff]  ;;  %v660_v50 = vmov 0.0|0.0  }
  0x13   :  { %580 = vmatpush3.bf16.msra.mxu1 %v579_v51  ;;  %550 = vmatprep.subr.bf16.mxu0 %v549_v52  ;;  %v32_v12 = vld [vmem:[%s1007_s1 + $0x68] sm:$0xff]  ;;  %v63_v15 = vld [vmem:[%s1007_s1 + $0x160] sm:$0xff]  ;;  %v589_v18 = vpack.c.bf16 %v80_v9, %v79_v8  ;;  %v49_v20 = vld [vmem:[%s1007_s1 + $0xf0] sm:$0xff] }
  0x14   :  { %582 = vmatprep.subr.bf16.mxu1 %v581_v56  ;;  %v13_v16 = vld [vmem:[%s1006_s0 + $0x8] sm:$0xff]  ;;  %v50_v21 = vld [vmem:[%s1007_s1 + $0xf8] sm:$0xff]  ;;  %v81_v22 = vld [vmem:[%s1007_s1 + $0x1f0] sm:$0xff]  ;;  %255 = vmatprep.mubr.f32.mxu1 %v15_v17  ;;  %v559_v24 = vpack.c.bf16 %v32_v12, %v31_v11 }
  0x15   :  { %v64_v19 = vld [vmem:[%s1007_s1 + $0x168] sm:$0xff]  ;;  %185 = vmatprep.mubr.f32.mxu0 %v13_v16  ;;  %v82_v23 = vld [vmem:[%s1007_s1 + $0x1f8] sm:$0xff]  ;;  %v561_v26 = vpack.c.bf16 %v50_v21, %v49_v20  ;;  %v33_v27 = vld [vmem:[%s1007_s1 + $0x70] sm:$0xff] }
  0x16   :  { %552 = vmatpush3.bf16.msra.mxu0 %v551_v62  ;;  %v591_v25 = vpack.c.bf16 %v64_v19, %v63_v15  ;;  %v34_v28 = vld [vmem:[%s1007_s1 + $0x78] sm:$0xff]  ;;  %v65_v29 = vld [vmem:[%s1007_s1 + $0x170] sm:$0xff]  ;;  %v593_v30 = vpack.c.bf16 %v82_v23, %v81_v22  ;;  %v99_v32 = vld [vmem:[%s1007_s1 + $0x280] sm:$0xff] }
  0x17   :  { %584 = vmatpush3.bf16.msra.mxu1 %v583_v63  ;;  %554 = vmatprep.subr.bf16.mxu0 %v553_v0  ;;  %v66_v31 = vld [vmem:[%s1007_s1 + $0x178] sm:$0xff]  ;;  %v100_v33 = vld [vmem:[%s1007_s1 + $0x288] sm:$0xff]  ;;  %v563_v34 = vpack.c.bf16 %v34_v28, %v33_v27  ;;  %v83_v37 = vld [vmem:[%s1007_s1 + $0x200] sm:$0xff] }
  0x18   :  { %586 = vmatprep.subr.bf16.mxu1 %v585_v4  ;;  %v595_v35 = vpack.c.bf16 %v66_v31, %v65_v29  ;;  %v597_v36 = vpack.c.bf16 %v100_v33, %v99_v32  ;;  %v84_v38 = vld [vmem:[%s1007_s1 + $0x208] sm:$0xff]  ;;  %v101_v39 = vld [vmem:[%s1007_s1 + $0x290] sm:$0xff]  ;;  %v102_v40 = vld [vmem:[%s1007_s1 + $0x298] sm:$0xff] }
  0x19   :  { %v12_v41 = vld [vmem:[%s1006_s0] sm:$0xff]  ;;  %v14_v42 = vld [vmem:[%s1006_s0 + $0x10] sm:$0xff]  ;;  %v599_v43 = vpack.c.bf16 %v84_v38, %v83_v37  ;;  %v601_v45 = vpack.c.bf16 %v102_v40, %v101_v39  ;;  %v86_v46 = vld [vmem:[%s1007_s1 + $0x218] sm:$0xff] }
  0x1a   :  { %556 = vmatpush3.bf16.msra.mxu0 %v555_v10  ;;  %v85_v44 = vld [vmem:[%s1007_s1 + $0x210] sm:$0xff]  ;;  %v103_v47 = vld [vmem:[%s1007_s1 + $0x2a0] sm:$0xff]  ;;  %v104_v48 = vld [vmem:[%s1007_s1 + $0x2a8] sm:$0xff] }
  0x1b   :  { %588 = vmatpush3.bf16.msra.mxu1 %v587_v13  ;;  %558 = vmatprep.subr.bf16.mxu0 %v557_v14  ;;  %v17_v49 = vld [vmem:[%s1006_s0 + $0x28] sm:$0xff]  ;;  %v115_v51 = vld [vmem:[%s1007_s1 + $0x300] sm:$0xff] }
  0x1c   :  { %590 = vmatprep.subr.bf16.mxu1 %v589_v18  ;;  %v116_v52 = vld [vmem:[%s1007_s1 + $0x308] sm:$0xff] }
  0x1d   :  { %v630_v53 = vpack.c.bf16 %v116_v52, %v115_v51 }
  0x1e   :  { %560 = vmatpush3.bf16.msra.mxu0 %v559_v24 }
  0x1f   :  { %592 = vmatpush3.bf16.msra.mxu1 %v591_v25  ;;  %562 = vmatprep.subr.bf16.mxu0 %v561_v26 }
  0x20   :  { %594 = vmatprep.subr.bf16.mxu1 %v593_v30 }
  0x22   :  { %564 = vmatpush3.bf16.msra.mxu0 %v563_v34 }
  0x23   :  { %596 = vmatpush3.bf16.msra.mxu1 %v595_v35  ;;  %598 = vmatprep.subr.bf16.mxu0 %v597_v36 }
  0x24   :  { %629 = vmatprep.subr.bf16.mxu1 %v660_v50 }
  0x25   :  { %186 = vmatmul.mubr.f32.vlgmr.msra.gmra.mrb[0].mxu0 %v12_v41 }
  0x26   :  { %7 = vsyncpa [#allocation3], 0  ;;  %256 = vmatmul.mubr.f32.vlgmr.msra.gmra.mrb[0].mxu1 %v14_v42  ;;  %600 = vmatpush3.bf16.msra.mxu0 %v599_v43  ;;  %v603_v54 = vpack.c.bf16 %v86_v46, %v85_v44  ;;  %v605_v55 = vpack.c.bf16 %v104_v48, %v103_v47  ;;  %v87_v56 = vld [vmem:[%s1007_s1 + $0x220] sm:$0xff]  ;;  %v88_v57 = vld [vmem:[%s1007_s1 + $0x228] sm:$0xff]  ;;  %vm661_vm0 = vmmov 0   ;;  %v662_v60 = vmov 0.0  }
  0x27   :  { %602 = vmatprep.subr.bf16.mxu0 %v601_v45  ;;  %325 = vmatprep.mubr.f32.mxu0 %v17_v49  ;;  %v105_v58 = vld [vmem:[%s1007_s1 + $0x2b0] sm:$0xff]  ;;  %v106_v59 = vld [vmem:[%s1007_s1 + $0x2b8] sm:$0xff]  ;;  %vm117_vm1 = vcmask 130048   ;;  %v607_v62 = vpack.c.bf16 %v88_v57, %v87_v56  ;;  %v107_v2 = vld [vmem:[%s1007_s1 + $0x2c0] sm:$0xff]  ;;  %vm401_vm2 = vcmask 80896  }
  0x28   :  { %631 = vmatpush3.bf16.msra.mxu1 %v630_v53  ;;  %530 = vmatprep.mubr.msk.f32.mxu1 %vm661_vm0, %v662_v60  ;;  %v18_v61 = vld [vmem:[%s1006_s0 + $0x30] sm:$0xff]  ;;  %v609_v63 = vpack.c.bf16 %v106_v59, %v105_v58  ;;  %v90_v1 = vld [vmem:[%s1007_s1 + $0x238] sm:$0xff]  ;;  %v108_v3 = vld [vmem:[%s1007_s1 + $0x2c8] sm:$0xff] }
  0x29   :  { %v89_v0 = vld [vmem:[%s1007_s1 + $0x230] sm:$0xff]  ;;  %v613_v5 = vpack.c.bf16 %v108_v3, %v107_v2  ;;  %v91_v6 = vld [vmem:[%s1007_s1 + $0x240] sm:$0xff]  ;;  %v92_v7 = vld [vmem:[%s1007_s1 + $0x248] sm:$0xff] }
  0x2a   :  { %604 = vmatpush3.bf16.msra.mxu0 %v603_v54  ;;  %v611_v4 = vpack.c.bf16 %v90_v1, %v89_v0  ;;  %v109_v8 = vld [vmem:[%s1007_s1 + $0x2d0] sm:$0xff]  ;;  %v110_v9 = vld [vmem:[%s1007_s1 + $0x2d8] sm:$0xff]  ;;  %v615_v10 = vpack.c.bf16 %v92_v7, %v91_v6  ;;  %v111_v14 = vld [vmem:[%s1007_s1 + $0x2e0] sm:$0xff] }
  0x2b   :  { %606 = vmatprep.subr.bf16.mxu0 %v605_v55  ;;  %531 = vmatmul.mubr.msk.f32.vlgmr.msra.gmra.mrb[2].mxu1 %vm117_vm1, %v18_v61  ;;  %v617_v11 = vpack.c.bf16 %v110_v9, %v109_v8  ;;  %v93_v12 = vld [vmem:[%s1007_s1 + $0x250] sm:$0xff]  ;;  %v94_v13 = vld [vmem:[%s1007_s1 + $0x258] sm:$0xff]  ;;  %v112_v15 = vld [vmem:[%s1007_s1 + $0x2e8] sm:$0xff] }
  0x2c   :  { %v619_v16 = vpack.c.bf16 %v94_v13, %v93_v12  ;;  %v621_v17 = vpack.c.bf16 %v112_v15, %v111_v14  ;;  %v95_v18 = vld [vmem:[%s1007_s1 + $0x260] sm:$0xff]  ;;  %v96_v19 = vld [vmem:[%s1007_s1 + $0x268] sm:$0xff]  ;;  %v113_v20 = vld [vmem:[%s1007_s1 + $0x2f0] sm:$0xff] }
  0x2d   :  { %v114_v21 = vld [vmem:[%s1007_s1 + $0x2f8] sm:$0xff]  ;;  %v623_v22 = vpack.c.bf16 %v96_v19, %v95_v18  ;;  %v97_v24 = vld [vmem:[%s1007_s1 + $0x270] sm:$0xff]  ;;  %v16_v27 = vld [vmem:[%s1006_s0 + $0x20] sm:$0xff] }
  0x2e   :  { %608 = vmatpush3.bf16.msra.mxu0 %v607_v62  ;;  %v625_v23 = vpack.c.bf16 %v114_v21, %v113_v20  ;;  %v98_v25 = vld [vmem:[%s1007_s1 + $0x278] sm:$0xff]  ;;  %s663_s1 = smov [#allocation2]  }
  0x2f   :  { %610 = vmatprep.subr.bf16.mxu0 %v609_v63  ;;  %v627_v26 = vpack.c.bf16 %v98_v25, %v97_v24  ;;  %s409_s23 = sshll.u32 %s663_s1, 4  ;;  %s410_s23 = int_to_ptr.vmem [resolvable:$true] %s409_s23 }
  0x30   :  { %s636_s0 = scalar_lea.vmem %s410_s23, 128  ;;  %p641_p1 = scmp.lt.s32.totalorder %s410_s23, %s410_s23 }
  0x31   :  { %p637_p0 = scmp.ne.s32.totalorder %s410_s23, %s636_s0  ;;  %p642_p2 = scmp.lt.s32.totalorder %s636_s0, %s636_s0 }
  0x32   :  { %612 = vmatpush3.bf16.msra.mxu0 %v611_v4 }
  0x33   :  { %614 = vmatprep.subr.bf16.mxu0 %v613_v5  ;;  %p643_p3 = por %p642_p2, %p641_p1 }
  0x35   :  { %p644_p4 = pnand %p643_p3, %p637_p0 }
  0x36   :  { %616 = vmatpush3.bf16.msra.mxu0 %v615_v10 }
  0x37   :  { %618 = vmatprep.subr.bf16.mxu0 %v617_v11 }
  0x3a   :  { %620 = vmatpush3.bf16.msra.mxu0 %v619_v16 }
  0x3b   :  { %622 = vmatprep.subr.bf16.mxu0 %v621_v17 }
  0x3e   :  { %624 = vmatpush3.bf16.msra.mxu0 %v623_v22 }
  0x3f   :  { %626 = vmatprep.subr.bf16.mxu0 %v625_v23 }
  0x42   :  { %628 = vmatpush3.bf16.msra.mxu0 %v627_v26 }
  0x45   :  { %326 = vmatmul.mubr.f32.vlgmr.msra.gmra.mrb[2].mxu0 %v16_v27 }
  0xf8   :  { %v450_v28 = vpop.f32.mrb[0].mxu0 }
  0xf9   :  { %v485_v29 = vpop.f32.mrb[0].mxu1  ;;  %v451_v30 = vpop.f32.mrb[1].mxu0 }
  0xfa   :  { %v452_v31 = vadd.f32 %v451_v30, %v450_v28  ;;  %v486_v32 = vpop.f32.mrb[1].mxu1 }
  0xfb   :  { %v487_v33 = vadd.f32 %v486_v32, %v485_v29 }
  0xfd   :  { %v258_v34 = vadd.f32 %v487_v33, %v452_v31 }
  0xfe   :  { %v397_v35 = vpop.f32.mrb[2].mxu1 }
  0xff   :  { %v532_v36 = vpop.f32.mrb[3].mxu1 }
 0x118   :  { %v520_v37 = vpop.f32.mrb[2].mxu0 }
 0x119   :  { %v521_v38 = vpop.f32.mrb[3].mxu0 }
 0x11a   :  { %v522_v39 = vadd.f32 %v521_v38, %v520_v37 }
 0x11c   :  { %v328_v40 = vadd.f32 %v522_v39, %v258_v34 }
 0x11e   :  { %v398_v41 = vadd.f32 %v397_v35, %v328_v40 }
 0x120   :  { %402 = vst.msk [vmem:[#allocation2] sm:$0xff] %vm401_vm2, %v398_v41 }
 0x121   :  { %647 = shalt.err (!%p644_p4)
}
 0x122   :  { %s648_s26 = scalar_lea.hbm %s1008_s2, 128 }
 0x123   :  { %p649_p5 = scmp.ne.s32.totalorder %s1008_s2, %s648_s26  ;;  %p652_p6 = scmp.lt.u32.totalorder %s648_s26, %s1008_s2 }
 0x125   :  { %p654_p7 = pnand %p652_p6, %p649_p5 }
 0x127   :  { %657 = shalt.err (!%p654_p7)
}
 0x128   :  { %412 = dma.vmem_to_hbm [thread:$0]  %s410_s23, 128, %s1008_s2, [#allocation3]  }
 0x129   :  { %658 = dma.done.wait [#allocation3], 128  }
 0x12a   :  { %659 = vsyncadd [#allocation3], 4294967168 }
 0x12b   :  { %416 = vsyncpa [#allocation3], 1 }

</bundles_post_ra>
